<compile_context>
chip_gen: v5e
topology: v5e:2x2
jax: 0.10.0
libtpu: 0.0.40
codegen_flags: <defaults>
</compile_context>

<pallas_src>
import jax
import jax.numpy as jnp
from jax.experimental import pallas as pl
from jax.experimental.pallas import tpu as pltpu


def _bilinear_matrix(in_size: int, out_size: int) -> jnp.ndarray:
    """[out_size, in_size] interpolation matrix, PyTorch bilinear, align_corners=False."""
    scale = in_size / out_size
    dst = jnp.arange(out_size, dtype=jnp.float32)
    src = (dst + 0.5) * scale - 0.5
    src = jnp.maximum(src, 0.0)                      # PyTorch clamps negative source coords
    x0 = jnp.floor(src)
    lam = src - x0
    x0i = jnp.clip(x0.astype(jnp.int32), 0, in_size - 1)
    x1i = jnp.minimum(x0i + 1, in_size - 1)
    a = (jax.nn.one_hot(x0i, in_size, dtype=jnp.float32) * (1.0 - lam)[:, None]
         + jax.nn.one_hot(x1i, in_size, dtype=jnp.float32) * lam[:, None])
    return a


def _dsv_kernel(w_ref, b_ref, x_ref, a_ref, o_ref):
    # w_ref: [C_out*C_in]       f32, SMEM (flattened 1x1 conv weight)
    # b_ref: [C_out]            f32, SMEM (conv bias)
    # x_ref: [C_in*BN, H*W]     f32, VMEM (channel-major, sublane-dense rows)
    # a_ref: [H*W, Ho*Wo]       bf16, VMEM (kron(Ah, Aw).T, fused interp matrix)
    # o_ref: [C_out*BN, Ho*Wo]  f32, VMEM (channel-major, lane-dense output)
    c_out = b_ref.shape[0]
    c_in = w_ref.shape[0] // c_out
    bn = x_ref.shape[0] // c_in

    a = a_ref[...]                                           # [H*W, Ho*Wo] bf16

    # Each input-channel slab [BN, H*W] is loaded once and reused for every
    # output channel.
    xs = [x_ref[pl.ds(c * bn, bn), :] for c in range(c_in)]

    # 1x1 conv on the VPU: f32 scalar-broadcast MACs, one slab per output
    # channel, stacked into a single LHS for the MXU.
    lhs_rows = []
    for o in range(c_out):
        acc = xs[0] * w_ref[o * c_in]
        for c in range(1, c_in):
            acc = acc + xs[c] * w_ref[o * c_in + c]
        lhs_rows.append(acc + b_ref[o])
    lhs = jnp.concatenate(lhs_rows, axis=0)                  # [C_out*BN, H*W] f32

    # Fused bilinear upsample: ONE MXU matmul (bf16 operands, f32 accum) and
    # ONE full-block lane-dense store.
    out = jnp.dot(lhs.astype(jnp.bfloat16), a,
                  preferred_element_type=jnp.float32)        # [C_out*BN, Ho*Wo]
    o_ref[...] = out.astype(o_ref.dtype)


def dsv_block(x, conv_w, conv_b, scale_factor: int, *, out_dtype=jnp.float32):
    """x: [N, C_in, H, W] NCHW. conv_w: [C_out, C_in, 1, 1]. conv_b: [C_out]."""
    n, c_in, h, w = x.shape
    c_out = conv_w.shape[0]
    ho, wo = h * scale_factor, w * scale_factor
    hw, howo = h * w, ho * wo

    # Small conv params as flat SMEM scalars.
    w_flat = conv_w.reshape(c_out * c_in).astype(jnp.float32)
    b_vec = conv_b.reshape(c_out).astype(jnp.float32)

    # Fused separable bilinear interpolation matrix (transposed), bf16 for the MXU.
    ah = _bilinear_matrix(h, ho)                             # [Ho, H]
    aw = _bilinear_matrix(w, wo)                             # [Wo, W]
    a_t = jnp.kron(ah, aw).T.astype(jnp.bfloat16)            # [H*W, Ho*Wo]

    # Channel-major 2D layout: rows = C_in*N (sublane-dense), lanes = H*W.
    x_2d = x.reshape(n, c_in, hw).transpose(1, 0, 2).reshape(c_in * n, hw)

    out_2d = pl.pallas_call(
        _dsv_kernel,
        out_shape=jax.ShapeDtypeStruct((c_out * n, howo), out_dtype),
        grid_spec=pltpu.PrefetchScalarGridSpec(
            num_scalar_prefetch=0,
            grid=(1,),
            in_specs=[
                pl.BlockSpec(memory_space=pltpu.MemorySpace.SMEM),   # conv weight
                pl.BlockSpec(memory_space=pltpu.MemorySpace.SMEM),   # conv bias
                pl.BlockSpec((c_in * n, hw), lambda i: (0, 0)),      # x, 2D sublane-dense
                pl.BlockSpec((hw, howo), lambda i: (0, 0),
                             pipeline_mode=pl.Buffered(1)),          # constant interp matrix
            ],
            out_specs=pl.BlockSpec((c_out * n, howo), lambda i: (0, 0)),
        ),
        compiler_params=pltpu.CompilerParams(
            dimension_semantics=("parallel",),
            vmem_limit_bytes=32 * 1024 * 1024,
        ),
    )(w_flat, b_vec, x_2d, a_t)

    # Back to NCHW.
    return out_2d.reshape(c_out, n, ho, wo).transpose(1, 0, 2, 3)


def _reference_f32(x, conv_w, conv_b, scale_factor):
    # Pure-f32 reference (PyTorch semantics): 1x1 conv + separable bilinear upsample.
    n, c_in, h, w = x.shape
    c_out = conv_w.shape[0]
    y = jnp.einsum('oc,nchw->nohw', conv_w.reshape(c_out, c_in), x) \
        + conv_b.reshape(1, c_out, 1, 1)
    ah = _bilinear_matrix(h, h * scale_factor)
    aw = _bilinear_matrix(w, w * scale_factor)
    z = jnp.einsum('pw,nchw->nchp', aw, y)
    return jnp.einsum('oh,nchp->ncop', ah, z)


def _reference_mixed(x, conv_w, conv_b, scale_factor):
    # Mirrors the kernel's precision: f32 conv, bf16 operands into the interp matmul.
    n, c_in, h, w = x.shape
    c_out = conv_w.shape[0]
    ho, wo = h * scale_factor, w * scale_factor
    y = jnp.einsum('oc,nchw->nohw', conv_w.reshape(c_out, c_in), x) \
        + conv_b.reshape(1, c_out, 1, 1)
    a_t = jnp.kron(_bilinear_matrix(h, ho), _bilinear_matrix(w, wo)).T.astype(jnp.bfloat16)
    y_flat = y.reshape(n, c_out, h * w).astype(jnp.bfloat16).astype(jnp.float32)
    out = jnp.einsum('ncq,qp->ncp', y_flat, a_t.astype(jnp.float32))
    return out.reshape(n, c_out, ho, wo)


if __name__ == "__main__":
    # 1x1 conv (in=4, out=2) + bilinear upsample x2, batch=2, 16x16 spatial.
    in_size, out_size, scale_factor = 4, 2, 2
    batch, H, W = 2, 16, 16

    key = jax.random.PRNGKey(0)
    kx, kw, kb = jax.random.split(key, 3)
    x = jax.random.normal(kx, (batch, in_size, H, W), dtype=jnp.float32)
    conv_w = jax.random.normal(kw, (out_size, in_size, 1, 1), dtype=jnp.float32) * 0.1
    conv_b = jax.random.normal(kb, (out_size,), dtype=jnp.float32) * 0.1

    out = dsv_block(x, conv_w, conv_b, scale_factor)
    out = jax.block_until_ready(out)

    assert out.shape == (batch, out_size, H * scale_factor, W * scale_factor)

    ref_mixed = _reference_mixed(x, conv_w, conv_b, scale_factor)
    assert jnp.allclose(out, ref_mixed, atol=2e-3, rtol=2e-3), \
        "mismatch vs precision-matched reference"

    ref_f32 = _reference_f32(x, conv_w, conv_b, scale_factor)
    assert jnp.allclose(out, ref_f32, atol=2e-2, rtol=2e-2), \
        "mismatch vs f32 (PyTorch-semantics) reference"

    print("KERNEL_OK")
</pallas_src>

<mosaic_0001>
module attributes {stable_mosaic.version = 11 : i64} {
  func.func @_dsv_kernel(%arg0: i32, %arg1: memref<8xf32, #tpu.memory_space<smem>>, %arg2: memref<2xf32, #tpu.memory_space<smem>>, %arg3: memref<8x256xf32, #tpu.memory_space<vmem>>, %arg4: memref<256x1024xbf16, #tpu.memory_space<vmem>>, %arg5: memref<4x1024xf32, #tpu.memory_space<vmem>>) attributes {dimension_semantics = [#tpu.dimension_semantics<parallel>], iteration_bounds = array<i64: 1>, scalar_prefetch = 0 : i64, scratch_operands = 0 : i64, tpu.core_type = #tpu.core_type<tc>, window_params = [{transform_indices = @transform_0, window_bounds = array<i64: 8>}, {transform_indices = @transform_1, window_bounds = array<i64: 2>}, {pipeline_mode = #tpu.pipeline_mode<synchronous>, transform_indices = @transform_2, window_bounds = array<i64: 8, 256>}, {pipeline_mode = #tpu.pipeline_mode<synchronous>, transform_indices = @transform_3, window_bounds = array<i64: 256, 1024>}, {pipeline_mode = #tpu.pipeline_mode<synchronous>, transform_indices = @transform_4, window_bounds = array<i64: 4, 1024>}]} {
    %c0 = arith.constant 0 : index
    %c0_0 = arith.constant 0 : index
    %0 = vector.load %arg4[%c0, %c0_0] : memref<256x1024xbf16, #tpu.memory_space<vmem>>, vector<256x1024xbf16>
    %c0_1 = arith.constant 0 : index
    %c0_2 = arith.constant 0 : index
    %1 = vector.load %arg3[%c0_1, %c0_2] : memref<8x256xf32, #tpu.memory_space<vmem>>, vector<2x256xf32>
    %c2 = arith.constant 2 : index
    %c0_3 = arith.constant 0 : index
    %2 = vector.load %arg3[%c2, %c0_3] : memref<8x256xf32, #tpu.memory_space<vmem>>, vector<2x256xf32>
    %c4 = arith.constant 4 : index
    %c0_4 = arith.constant 0 : index
    %3 = vector.load %arg3[%c4, %c0_4] : memref<8x256xf32, #tpu.memory_space<vmem>>, vector<2x256xf32>
    %c6 = arith.constant 6 : index
    %c0_5 = arith.constant 0 : index
    %4 = vector.load %arg3[%c6, %c0_5] : memref<8x256xf32, #tpu.memory_space<vmem>>, vector<2x256xf32>
    %c0_6 = arith.constant 0 : index
    %5 = memref.load %arg1[%c0_6] : memref<8xf32, #tpu.memory_space<smem>>
    %6 = vector.broadcast %5 : f32 to vector<2x256xf32>
    %7 = arith.mulf %1, %6 : vector<2x256xf32>
    %c1 = arith.constant 1 : index
    %8 = memref.load %arg1[%c1] : memref<8xf32, #tpu.memory_space<smem>>
    %9 = vector.broadcast %8 : f32 to vector<2x256xf32>
    %10 = arith.mulf %2, %9 : vector<2x256xf32>
    %11 = arith.addf %7, %10 : vector<2x256xf32>
    %c2_7 = arith.constant 2 : index
    %12 = memref.load %arg1[%c2_7] : memref<8xf32, #tpu.memory_space<smem>>
    %13 = vector.broadcast %12 : f32 to vector<2x256xf32>
    %14 = arith.mulf %3, %13 : vector<2x256xf32>
    %15 = arith.addf %11, %14 : vector<2x256xf32>
    %c3 = arith.constant 3 : index
    %16 = memref.load %arg1[%c3] : memref<8xf32, #tpu.memory_space<smem>>
    %17 = vector.broadcast %16 : f32 to vector<2x256xf32>
    %18 = arith.mulf %4, %17 : vector<2x256xf32>
    %19 = arith.addf %15, %18 : vector<2x256xf32>
    %c0_8 = arith.constant 0 : index
    %20 = memref.load %arg2[%c0_8] : memref<2xf32, #tpu.memory_space<smem>>
    %21 = vector.broadcast %20 : f32 to vector<2x256xf32>
    %22 = arith.addf %19, %21 : vector<2x256xf32>
    %c4_9 = arith.constant 4 : index
    %23 = memref.load %arg1[%c4_9] : memref<8xf32, #tpu.memory_space<smem>>
    %24 = vector.broadcast %23 : f32 to vector<2x256xf32>
    %25 = arith.mulf %1, %24 : vector<2x256xf32>
    %c5 = arith.constant 5 : index
    %26 = memref.load %arg1[%c5] : memref<8xf32, #tpu.memory_space<smem>>
    %27 = vector.broadcast %26 : f32 to vector<2x256xf32>
    %28 = arith.mulf %2, %27 : vector<2x256xf32>
    %29 = arith.addf %25, %28 : vector<2x256xf32>
    %c6_10 = arith.constant 6 : index
    %30 = memref.load %arg1[%c6_10] : memref<8xf32, #tpu.memory_space<smem>>
    %31 = vector.broadcast %30 : f32 to vector<2x256xf32>
    %32 = arith.mulf %3, %31 : vector<2x256xf32>
    %33 = arith.addf %29, %32 : vector<2x256xf32>
    %c7 = arith.constant 7 : index
    %34 = memref.load %arg1[%c7] : memref<8xf32, #tpu.memory_space<smem>>
    %35 = vector.broadcast %34 : f32 to vector<2x256xf32>
    %36 = arith.mulf %4, %35 : vector<2x256xf32>
    %37 = arith.addf %33, %36 : vector<2x256xf32>
    %c1_11 = arith.constant 1 : index
    %38 = memref.load %arg2[%c1_11] : memref<2xf32, #tpu.memory_space<smem>>
    %39 = vector.broadcast %38 : f32 to vector<2x256xf32>
    %40 = arith.addf %37, %39 : vector<2x256xf32>
    %41 = tpu.concatenate %22, %40 in 0 : vector<2x256xf32>, vector<2x256xf32> -> vector<4x256xf32>
    %42 = arith.truncf %41 : vector<4x256xf32> to vector<4x256xbf16>
    %cst = arith.constant dense<0.000000e+00> : vector<4x1024xf32>
    %43 = tpu.matmul %42, %0, %cst {dimension_numbers = #tpu.dot_dimension_numbers<[1], [0], [0], [1], [0, 0, 1, 1], [], []>} : vector<4x256xbf16>, vector<256x1024xbf16>, vector<4x1024xf32> -> vector<4x1024xf32>
    %c0_12 = arith.constant 0 : index
    %c0_13 = arith.constant 0 : index
    %44 = vector.load %arg5[%c0_12, %c0_13] : memref<4x1024xf32, #tpu.memory_space<vmem>>, vector<4x1024xf32>
    tpu.vector_store %arg5[%c0_12, %c0_13], %43 {strides = array<i32>} : memref<4x1024xf32, #tpu.memory_space<vmem>>, vector<4x1024xf32>,
    return
  }
  func.func @transform_0(%arg0: i32) -> i32 {
    %c0_i32 = arith.constant 0 : i32
    %c0_i32_0 = arith.constant 0 : i32
    return %c0_i32 : i32
  }
  func.func @transform_1(%arg0: i32) -> i32 {
    %c0_i32 = arith.constant 0 : i32
    %c0_i32_0 = arith.constant 0 : i32
    return %c0_i32 : i32
  }
  func.func @transform_2(%arg0: i32) -> (i32, i32) {
    %c0_i32 = arith.constant 0 : i32
    %c0_i32_0 = arith.constant 0 : i32
    %c0_i32_1 = arith.constant 0 : i32
    return %c0_i32, %c0_i32_0 : i32, i32
  }
  func.func @transform_3(%arg0: i32) -> (i32, i32) {
    %c0_i32 = arith.constant 0 : i32
    %c0_i32_0 = arith.constant 0 : i32
    %c0_i32_1 = arith.constant 0 : i32
    return %c0_i32, %c0_i32_0 : i32, i32
  }
  func.func @transform_4(%arg0: i32) -> (i32, i32) {
    %c0_i32 = arith.constant 0 : i32
    %c0_i32_0 = arith.constant 0 : i32
    %c0_i32_1 = arith.constant 0 : i32
    return %c0_i32, %c0_i32_0 : i32, i32
  }
}

</mosaic_0001>

<bundles_post_ra>
// kernel: tpu_custom_call.1
= control target key start
LH: loop header
LB: loop body
LE: loop exit
PB: predicated region body
PF: predicated region fallthrough
CT: control target
= control target key end

     0   :  { %9 = vsyncpa [#allocation5], 0  ;;  %s2148_s0 = inlined_call_operand.hbm [shape: f32[8], index: 0, kind: input, shape index: {}]   ;;  %s2149_s1 = inlined_call_operand.hbm [shape: f32[2], index: 1, kind: input, shape index: {}]   ;;  %s2150_s2 = inlined_call_operand.hbm [shape: f32[8,256], index: 2, kind: input, shape index: {}]   ;;  %s2151_s3 = inlined_call_operand.hbm [shape: bf16[256,1024], index: 3, kind: input, shape index: {}]   ;;  %s2152_s4 = inlined_call_operand.hbm [shape: f32[4,1024], index: 4, kind: output, shape index: {}]  }
   0x1   :  { %10 = vsyncpa [#allocation7], 0 }
   0x2   :  { %11 = vsyncpa [#allocation3], 0 }
   0x3   :  { %12 = vsyncpa [#allocation10], 0 }
   0x4   :  { %13 = vsyncpa [#allocation4], 0  ;;  %s19_s17 = sshll.u32 %s2148_s0, 4  ;;  %s28_s20 = sshll.u32 %s2149_s1, 4  ;;  %s20_s17 = int_to_ptr.hbm [resolvable:$true] %s19_s17  ;;  %s29_s20 = int_to_ptr.hbm [resolvable:$true] %s28_s20 }
   0x5   :  { %s1962_s21 = smov [#allocation2]   ;;  %s1963_s22 = smov [#allocation6]  }
   0x6   :  { %22 = dma.hbm_to_smem %s20_s17, 16, %s1962_s21, [#allocation5]  }
   0x7   :  { %31 = dma.hbm_to_smem %s29_s20, 16, %s1963_s22, [#allocation7]  }
   0x8   :  { %s37_s25 = sshll.u32 %s2150_s2, 4  ;;  %s1964_s26 = smov [#allocation8]   ;;  %s38_s25 = int_to_ptr.hbm [resolvable:$true] %s37_s25 }
   0x9   :  { %s39_s27 = sshll.u32 %s1964_s26, 4  ;;  %s47_s29 = sshll.u32 %s2151_s3, 4  ;;  %s40_s27 = int_to_ptr.vmem [resolvable:$true] %s39_s27  ;;  %s48_s29 = int_to_ptr.hbm [resolvable:$true] %s47_s29 }
   0xa   :  { %42 = dma.hbm_to_vmem [thread:$0]  %s38_s25, 256, %s40_s27, [#allocation3]  }
   0xb   :  { %s1965_s1 = smov [#allocation9]   ;;  %s1966_s5 = smov 512  }
   0xc   :  { %s49_s30 = sshll.u32 %s1965_s1, 4  ;;  %s1967_s6 = smov 32   ;;  %s50_s30 = int_to_ptr.vmem [resolvable:$true] %s49_s30 }
   0xd   :  { %55 = dma.hbm_to_vmem [thread:$0]  %s48_s29, 16384, %s50_s30, [#allocation10], %s1966_s5, %s1966_s5, %s1967_s6  }
   0xe   :  { %1952 = dma.done.wait [#allocation5], 16  }
   0xf   :  { %1953 = vsyncadd [#allocation5], 4294967280 }
  0x10   :  { %1954 = dma.done.wait [#allocation7], 16  }
  0x11   :  { %1955 = vsyncadd [#allocation7], 4294967280 }
  0x12   :  { %1956 = dma.done.wait [#allocation3], 256  }
  0x13   :  { %1957 = vsyncadd [#allocation3], 4294967040 }
  0x14   :  { %1958 = dma.done.wait [#allocation10], 16384  }
  0x15   :  { %1959 = vsyncadd [#allocation10], 4294950912 }
  0x16   :  { %72 = sfence }
  0x17   :  { %v1435_v0 = vld [vmem:[#allocation9 + $0x1c0] sm:$0xf]  ;;  %v1777_v5 = vld [vmem:[#allocation9 + $0x1c4] sm:$0xf]  ;;  %s2012_s2 = sld [smem:[#allocation2]]  ;;  %vm303_vm0 = vcmask 1041408  }
  0x18   :  { %v1781_v1 = vld [vmem:[#allocation9 + $0x1dc] sm:$0xf0]  ;;  %v1437_v6 = vld [vmem:[#allocation9 + $0x1e0] sm:$0xf0]  ;;  %s2026_s3 = sld [smem:[#allocation2 + $0x1]]  ;;  %vm1168_vm1 = vcmask 1043456  }
  0x19   :  { %v1691_v2 = vld [vmem:[#allocation9 + $0x3c0] sm:$0xf]  ;;  %v1436_v3 = vor.u32 %v1781_v1, %v1435_v0  ;;  %v1440_v8 = vor.u32 %v1777_v5, %v1437_v6  ;;  %v1841_v9 = vld [vmem:[#allocation9 + $0x3c4] sm:$0xf]  ;;  %s2034_s7 = sld [smem:[#allocation2 + $0x2]]  ;;  %s1968_s15 = smov [#allocation11]  }
  0x1a   :  { %v1845_v4 = vld [vmem:[#allocation9 + $0x3dc] sm:$0xf0]  ;;  %v1693_v10 = vld [vmem:[#allocation9 + $0x3e0] sm:$0xf0]  ;;  %s2040_s8 = sld [smem:[#allocation2 + $0x3]]  ;;  %s1186_s16 = sshll.u32 %s1968_s15, 4  ;;  %s1187_s16 = int_to_ptr.vmem [resolvable:$true] %s1186_s16 }
  0x1b   :  { %v1692_v7 = vor.u32 %v1845_v4, %v1691_v2  ;;  %v1403_v11 = vld [vmem:[#allocation9 + $0x180] sm:$0xf]  ;;  %948 = vmatpush.bf16.msra.mxu0 %v1436_v3  ;;  %v1696_v12 = vor.u32 %v1841_v9, %v1693_v10  ;;  %974 = vmatpush.bf16.msra.mxu2 %v1440_v8  ;;  %v1769_v18 = vld [vmem:[#allocation9 + $0x184] sm:$0xf]  ;;  %s2051_s9 = sld [smem:[#allocation2 + $0x4]]  ;;  %s1188_s19 = sshll.u32 %s2152_s4, 4  ;;  %s1189_s19 = int_to_ptr.hbm [resolvable:$true] %s1188_s19 }
  0x1c   :  { %v1773_v13 = vld [vmem:[#allocation9 + $0x19c] sm:$0xf0]  ;;  %v1405_v19 = vld [vmem:[#allocation9 + $0x1a0] sm:$0xf0]  ;;  %s2062_s10 = sld [smem:[#allocation2 + $0x5]] }
  0x1d   :  { %v1659_v14 = vld [vmem:[#allocation9 + $0x380] sm:$0xf]  ;;  %961 = vmatpush.bf16.msra.mxu1 %v1692_v7  ;;  %v1404_v16 = vor.u32 %v1773_v13, %v1403_v11  ;;  %v1833_v20 = vld [vmem:[#allocation9 + $0x384] sm:$0xf]  ;;  %987 = vmatpush.bf16.msra.mxu3 %v1696_v12  ;;  %v1408_v21 = vor.u32 %v1769_v18, %v1405_v19  ;;  %s2075_s11 = sld [smem:[#allocation2 + $0x6]] }
  0x1e   :  { %v1837_v15 = vld [vmem:[#allocation9 + $0x39c] sm:$0xf0]  ;;  %v1661_v22 = vld [vmem:[#allocation9 + $0x3a0] sm:$0xf0]  ;;  %s2082_s12 = sld [smem:[#allocation2 + $0x7]] }
  0x1f   :  { %v1660_v17 = vor.u32 %v1837_v15, %v1659_v14  ;;  %v1371_v23 = vld [vmem:[#allocation9 + $0x140] sm:$0xf]  ;;  %v1664_v25 = vor.u32 %v1833_v20, %v1661_v22  ;;  %v1761_v28 = vld [vmem:[#allocation9 + $0x144] sm:$0xf]  ;;  %949 = vmatpush.bf16.msra.mxu0 %v1404_v16  ;;  %975 = vmatpush.bf16.msra.mxu2 %v1408_v21  ;;  %s2099_s13 = sld [smem:[#allocation6]] }
  0x20   :  { %v1765_v24 = vld [vmem:[#allocation9 + $0x15c] sm:$0xf0]  ;;  %v1373_v30 = vld [vmem:[#allocation9 + $0x160] sm:$0xf0]  ;;  %s2104_s14 = sld [smem:[#allocation6 + $0x1]] }
  0x21   :  { %v1627_v26 = vld [vmem:[#allocation9 + $0x340] sm:$0xf]  ;;  %v1372_v29 = vor.u32 %v1765_v24, %v1371_v23  ;;  %v1825_v31 = vld [vmem:[#allocation9 + $0x344] sm:$0xf]  ;;  %962 = vmatpush.bf16.msra.mxu1 %v1660_v17  ;;  %v1376_v34 = vor.u32 %v1761_v28, %v1373_v30  ;;  %988 = vmatpush.bf16.msra.mxu3 %v1664_v25  ;;  %v1443_v28 = vld [vmem:[#allocation9 + $0x1c8] sm:$0xf] }
  0x22   :  { %v1829_v27 = vld [vmem:[#allocation9 + $0x35c] sm:$0xf0]  ;;  %v1629_v32 = vld [vmem:[#allocation9 + $0x360] sm:$0xf0]  ;;  %v1699_v30 = vld [vmem:[#allocation9 + $0x3c8] sm:$0xf] }
  0x23   :  { %v1628_v33 = vor.u32 %v1829_v27, %v1627_v26  ;;  %v1339_v35 = vld [vmem:[#allocation9 + $0x100] sm:$0xf]  ;;  %v1632_v38 = vor.u32 %v1825_v31, %v1629_v32  ;;  %v1753_v40 = vld [vmem:[#allocation9 + $0x104] sm:$0xf]  ;;  %950 = vmatpush.bf16.msra.mxu0 %v1372_v29  ;;  %976 = vmatpush.bf16.msra.mxu2 %v1376_v34  ;;  %v1782_v29 = vld [vmem:[#allocation9 + $0x1e4] sm:$0xf0] }
  0x24   :  { %v1757_v36 = vld [vmem:[#allocation9 + $0x11c] sm:$0xf0]  ;;  %v1341_v41 = vld [vmem:[#allocation9 + $0x120] sm:$0xf0]  ;;  %v1846_v32 = vld [vmem:[#allocation9 + $0x3e4] sm:$0xf0] }
  0x25   :  { %v1595_v37 = vld [vmem:[#allocation9 + $0x300] sm:$0xf]  ;;  %v1817_v42 = vld [vmem:[#allocation9 + $0x304] sm:$0xf]  ;;  %v1340_v44 = vor.u32 %v1757_v36, %v1339_v35  ;;  %963 = vmatpush.bf16.msra.mxu1 %v1628_v33  ;;  %v1344_v46 = vor.u32 %v1753_v40, %v1341_v41  ;;  %989 = vmatpush.bf16.msra.mxu3 %v1632_v38  ;;  %v1778_v33 = vld [vmem:[#allocation9 + $0x1cc] sm:$0xf]  ;;  %v1444_v40 = vor.u32 %v1782_v29, %v1443_v28 }
  0x26   :  { %v1821_v39 = vld [vmem:[#allocation9 + $0x31c] sm:$0xf0]  ;;  %v1597_v43 = vld [vmem:[#allocation9 + $0x320] sm:$0xf0]  ;;  %v1445_v34 = vld [vmem:[#allocation9 + $0x1e8] sm:$0xf0]  ;;  %v1700_v41 = vor.u32 %v1846_v32, %v1699_v30 }
  0x27   :  { %v1596_v45 = vor.u32 %v1821_v39, %v1595_v37  ;;  %v1307_v47 = vld [vmem:[#allocation9 + $0xc0] sm:$0xf]  ;;  %v1600_v50 = vor.u32 %v1817_v42, %v1597_v43  ;;  %v1745_v52 = vld [vmem:[#allocation9 + $0xc4] sm:$0xf]  ;;  %951 = vmatpush.bf16.msra.mxu0 %v1340_v44  ;;  %977 = vmatpush.bf16.msra.mxu2 %v1344_v46  ;;  %v1842_v37 = vld [vmem:[#allocation9 + $0x3cc] sm:$0xf]  ;;  %v1448_v42 = vor.u32 %v1778_v33, %v1445_v34 }
  0x28   :  { %v1749_v48 = vld [vmem:[#allocation9 + $0xdc] sm:$0xf0]  ;;  %v1309_v53 = vld [vmem:[#allocation9 + $0xe0] sm:$0xf0]  ;;  %v1701_v38 = vld [vmem:[#allocation9 + $0x3e8] sm:$0xf0] }
  0x29   :  { %v1563_v49 = vld [vmem:[#allocation9 + $0x2c0] sm:$0xf]  ;;  %v1809_v54 = vld [vmem:[#allocation9 + $0x2c4] sm:$0xf]  ;;  %v1308_v56 = vor.u32 %v1749_v48, %v1307_v47  ;;  %964 = vmatpush.bf16.msra.mxu1 %v1596_v45  ;;  %v1312_v58 = vor.u32 %v1745_v52, %v1309_v53  ;;  %990 = vmatpush.bf16.msra.mxu3 %v1600_v50  ;;  %v1411_v43 = vld [vmem:[#allocation9 + $0x188] sm:$0xf]  ;;  %v1704_v46 = vor.u32 %v1842_v37, %v1701_v38 }
  0x2a   :  { %v1813_v51 = vld [vmem:[#allocation9 + $0x2dc] sm:$0xf0]  ;;  %v1565_v55 = vld [vmem:[#allocation9 + $0x2e0] sm:$0xf0]  ;;  %v1774_v44 = vld [vmem:[#allocation9 + $0x1a4] sm:$0xf0] }
  0x2b   :  { %v1564_v57 = vor.u32 %v1813_v51, %v1563_v49  ;;  %v1275_v59 = vld [vmem:[#allocation9 + $0x80] sm:$0xf]  ;;  %v1568_v62 = vor.u32 %v1809_v54, %v1565_v55  ;;  %v1737_v0 = vld [vmem:[#allocation9 + $0x84] sm:$0xf]  ;;  %952 = vmatpush.bf16.msra.mxu0 %v1308_v56  ;;  %978 = vmatpush.bf16.msra.mxu2 %v1312_v58  ;;  %v1667_v45 = vld [vmem:[#allocation9 + $0x388] sm:$0xf]  ;;  %v1412_v52 = vor.u32 %v1774_v44, %v1411_v43 }
  0x2c   :  { %v1741_v60 = vld [vmem:[#allocation9 + $0x9c] sm:$0xf0]  ;;  %v1277_v1 = vld [vmem:[#allocation9 + $0xa0] sm:$0xf0]  ;;  %v1838_v47 = vld [vmem:[#allocation9 + $0x3a4] sm:$0xf0] }
  0x2d   :  { %v1531_v61 = vld [vmem:[#allocation9 + $0x280] sm:$0xf]  ;;  %v1801_v2 = vld [vmem:[#allocation9 + $0x284] sm:$0xf]  ;;  %v1276_v4 = vor.u32 %v1741_v60, %v1275_v59  ;;  %965 = vmatpush.bf16.msra.mxu1 %v1564_v57  ;;  %v1280_v6 = vor.u32 %v1737_v0, %v1277_v1  ;;  %991 = vmatpush.bf16.msra.mxu3 %v1568_v62  ;;  %v1770_v48 = vld [vmem:[#allocation9 + $0x18c] sm:$0xf]  ;;  %v1668_v54 = vor.u32 %v1838_v47, %v1667_v45 }
  0x2e   :  { %v1805_v63 = vld [vmem:[#allocation9 + $0x29c] sm:$0xf0]  ;;  %v1533_v3 = vld [vmem:[#allocation9 + $0x2a0] sm:$0xf0]  ;;  %v1413_v49 = vld [vmem:[#allocation9 + $0x1a8] sm:$0xf0] }
  0x2f   :  { %v1532_v5 = vor.u32 %v1805_v63, %v1531_v61  ;;  %v1243_v7 = vld [vmem:[#allocation9 + $0x40] sm:$0xf]  ;;  %v1536_v10 = vor.u32 %v1801_v2, %v1533_v3  ;;  %v1729_v12 = vld [vmem:[#allocation9 + $0x44] sm:$0xf]  ;;  %953 = vmatpush.bf16.msra.mxu0 %v1276_v4  ;;  %979 = vmatpush.bf16.msra.mxu2 %v1280_v6  ;;  %v1834_v50 = vld [vmem:[#allocation9 + $0x38c] sm:$0xf]  ;;  %v1416_v55 = vor.u32 %v1770_v48, %v1413_v49 }
  0x30   :  { %v1733_v8 = vld [vmem:[#allocation9 + $0x5c] sm:$0xf0]  ;;  %v1245_v13 = vld [vmem:[#allocation9 + $0x60] sm:$0xf0]  ;;  %v1669_v51 = vld [vmem:[#allocation9 + $0x3a8] sm:$0xf0] }
  0x31   :  { %v1499_v9 = vld [vmem:[#allocation9 + $0x240] sm:$0xf]  ;;  %v1793_v14 = vld [vmem:[#allocation9 + $0x244] sm:$0xf]  ;;  %v1244_v16 = vor.u32 %v1733_v8, %v1243_v7  ;;  %966 = vmatpush.bf16.msra.mxu1 %v1532_v5  ;;  %v1248_v20 = vor.u32 %v1729_v12, %v1245_v13  ;;  %992 = vmatpush.bf16.msra.mxu3 %v1536_v10  ;;  %v1379_v53 = vld [vmem:[#allocation9 + $0x148] sm:$0xf]  ;;  %v1672_v59 = vor.u32 %v1834_v50, %v1669_v51 }
  0x32   :  { %v1797_v11 = vld [vmem:[#allocation9 + $0x25c] sm:$0xf0]  ;;  %v1501_v15 = vld [vmem:[#allocation9 + $0x260] sm:$0xf0]  ;;  %v1766_v56 = vld [vmem:[#allocation9 + $0x164] sm:$0xf0] }
  0x33   :  { %v1211_v17 = vld [vmem:[#allocation9] sm:$0xf]  ;;  %v1500_v19 = vor.u32 %v1797_v11, %v1499_v9  ;;  %v1721_v23 = vld [vmem:[#allocation9 + $0x4] sm:$0xf]  ;;  %v1504_v24 = vor.u32 %v1793_v14, %v1501_v15  ;;  %954 = vmatpush.bf16.msra.mxu0 %v1244_v16  ;;  %980 = vmatpush.bf16.msra.mxu2 %v1248_v20  ;;  %v1635_v57 = vld [vmem:[#allocation9 + $0x348] sm:$0xf]  ;;  %v1380_v2 = vor.u32 %v1766_v56, %v1379_v53 }
  0x34   :  { %v1725_v18 = vld [vmem:[#allocation9 + $0x1c] sm:$0xf0]  ;;  %v1213_v25 = vld [vmem:[#allocation9 + $0x20] sm:$0xf0]  ;;  %v1830_v58 = vld [vmem:[#allocation9 + $0x364] sm:$0xf0] }
  0x35   :  { %v1467_v21 = vld [vmem:[#allocation9 + $0x200] sm:$0xf]  ;;  %v1785_v26 = vld [vmem:[#allocation9 + $0x204] sm:$0xf]  ;;  %v1212_v31 = vor.u32 %v1725_v18, %v1211_v17  ;;  %967 = vmatpush.bf16.msra.mxu1 %v1500_v19  ;;  %v1216_v36 = vor.u32 %v1721_v23, %v1213_v25  ;;  %993 = vmatpush.bf16.msra.mxu3 %v1504_v24  ;;  %v1762_v60 = vld [vmem:[#allocation9 + $0x14c] sm:$0xf]  ;;  %v1636_v7 = vor.u32 %v1830_v58, %v1635_v57  ;;  %v238_v58 = vstv %s2040_s8 }
  0x36   :  { %v1789_v22 = vld [vmem:[#allocation9 + $0x21c] sm:$0xf0]  ;;  %v1469_v27 = vld [vmem:[#allocation9 + $0x220] sm:$0xf0]  ;;  %v1381_v61 = vld [vmem:[#allocation9 + $0x168] sm:$0xf0] }
  0x37   :  { %v1468_v35 = vor.u32 %v1789_v22, %v1467_v21  ;;  %v1472_v39 = vor.u32 %v1785_v26, %v1469_v27  ;;  %955 = vmatpush.bf16.msra.mxu0 %v1212_v31  ;;  %981 = vmatpush.bf16.msra.mxu2 %v1216_v36  ;;  %v1826_v62 = vld [vmem:[#allocation9 + $0x34c] sm:$0xf]  ;;  %v1347_v0 = vld [vmem:[#allocation9 + $0x108] sm:$0xf]  ;;  %v1384_v8 = vor.u32 %v1762_v60, %v1381_v61  ;;  %v201_v33 = vld [vmem:[#allocation8] sm:$0x3] }
  0x38   :  { %v1637_v63 = vld [vmem:[#allocation9 + $0x368] sm:$0xf0]  ;;  %v1758_v1 = vld [vmem:[#allocation9 + $0x124] sm:$0xf0]  ;;  %v203_v34 = vld [vmem:[#allocation8] sm:$0xc] }
  0x39   :  { %968 = vmatpush.bf16.msra.mxu1 %v1468_v35  ;;  %994 = vmatpush.bf16.msra.mxu3 %v1472_v39  ;;  %v1603_v3 = vld [vmem:[#allocation9 + $0x308] sm:$0xf]  ;;  %v1754_v5 = vld [vmem:[#allocation9 + $0x10c] sm:$0xf]  ;;  %v1640_v13 = vor.u32 %v1826_v62, %v1637_v63  ;;  %v1348_v23 = vor.u32 %v1758_v1, %v1347_v0  ;;  %v2053_v35 = vld [vmem:[#allocation8 + $0x8] sm:$0xc] }
  0x3a   :  { %v1822_v4 = vld [vmem:[#allocation9 + $0x324] sm:$0xf0]  ;;  %v1349_v6 = vld [vmem:[#allocation9 + $0x128] sm:$0xf0]  ;;  %v205_v39 = vld [vmem:[#allocation8] sm:$0x30] }
  0x3b   :  { %1000 = vmatpush.bf16.msrb.mxu0 %v1444_v40  ;;  %1026 = vmatpush.bf16.msrb.mxu2 %v1448_v42  ;;  %v2006_v9 = vld [vmem:[#allocation9 + $0x30c] sm:$0xf]  ;;  %v2008_v11 = vld [vmem:[#allocation9 + $0xc8] sm:$0xf]  ;;  %v1604_v26 = vor.u32 %v1822_v4, %v1603_v3  ;;  %v1352_v27 = vor.u32 %v1754_v5, %v1349_v6  ;;  %v210_v40 = vstv %s2012_s2  ;;  %v202_v47 = vld [vmem:[#allocation8 + $0x8] sm:$0x3]  ;;  %v254_v6 = vstv %s2051_s9 }
  0x3c   :  { %v1605_v10 = vld [vmem:[#allocation9 + $0x328] sm:$0xf0]  ;;  %v2010_v12 = vld [vmem:[#allocation9 + $0xe4] sm:$0xf0]  ;;  %v211_v50 = vmul.f32 %v210_v40, %v201_v33  ;;  %v207_v63 = vld [vmem:[#allocation8] sm:$0xc0]  ;;  %v212_v1 = vmul.f32 %v210_v40, %v202_v47 }
  0x3d   :  { %1013 = vmatpush.bf16.msrb.mxu1 %v1700_v41  ;;  %1039 = vmatpush.bf16.msrb.mxu3 %v1704_v46  ;;  %v2014_v14 = vld [vmem:[#allocation9 + $0x2c8] sm:$0xf]  ;;  %v2018_v16 = vld [vmem:[#allocation9 + $0xcc] sm:$0xf]  ;;  %v1608_v31 = vor.u32 %v2006_v9, %v1605_v10  ;;  %v1316_v32 = vor.u32 %v2010_v12, %v2008_v11  ;;  %v2064_v41 = vld [vmem:[#allocation8 + $0x8] sm:$0x30]  ;;  %v214_v46 = vstv %s2026_s3  ;;  %v239_v5 = vmul.f32 %v238_v58, %v207_v63 }
  0x3e   :  { %v2016_v15 = vld [vmem:[#allocation9 + $0x2e4] sm:$0xf0]  ;;  %v2020_v17 = vld [vmem:[#allocation9 + $0xe8] sm:$0xf0]  ;;  %v215_v51 = vmul.f32 %v214_v46, %v203_v34  ;;  %v216_v53 = vmul.f32 %v214_v46, %v2053_v35  ;;  %v258_v9 = vstv %s2062_s10  ;;  %v255_v12 = vmul.f32 %v254_v6, %v201_v33 }
  0x3f   :  { %1001 = vmatpush.bf16.msrb.mxu0 %v1412_v52  ;;  %1027 = vmatpush.bf16.msrb.mxu2 %v1416_v55  ;;  %v2022_v18 = vld [vmem:[#allocation9 + $0x2cc] sm:$0xf]  ;;  %v2028_v20 = vld [vmem:[#allocation9 + $0x88] sm:$0xf]  ;;  %v1572_v36 = vor.u32 %v2016_v15, %v2014_v14  ;;  %v1320_v37 = vor.u32 %v2018_v16, %v2020_v17  ;;  %v226_v52 = vstv %s2034_s7  ;;  %v270_v14 = vstv %s2075_s11  ;;  %v208_v15 = vld [vmem:[#allocation8 + $0x8] sm:$0xc0] }
  0x40   :  { %v2024_v19 = vld [vmem:[#allocation9 + $0x2e8] sm:$0xf0]  ;;  %v2030_v21 = vld [vmem:[#allocation9 + $0xa4] sm:$0xf0]  ;;  %v227_v57 = vmul.f32 %v226_v52, %v205_v39  ;;  %v219_v0 = vrot.slane %v215_v51, 2  ;;  %v271_v17 = vmul.f32 %v270_v14, %v205_v39 }
  0x41   :  { %1014 = vmatpush.bf16.msrb.mxu1 %v1668_v54  ;;  %1040 = vmatpush.bf16.msrb.mxu3 %v1672_v59  ;;  %v2032_v22 = vld [vmem:[#allocation9 + $0x288] sm:$0xf]  ;;  %v2038_v25 = vld [vmem:[#allocation9 + $0x8c] sm:$0xf]  ;;  %v1576_v38 = vor.u32 %v2022_v18, %v2024_v19  ;;  %v1284_v43 = vor.u32 %v2030_v21, %v2028_v20  ;;  %v228_v59 = vmul.f32 %v226_v52, %v2064_v41  ;;  %v282_v18 = vstv %s2082_s12 }
  0x42   :  { %v2036_v24 = vld [vmem:[#allocation9 + $0x2a4] sm:$0xf0]  ;;  %v2042_v28 = vld [vmem:[#allocation9 + $0xa8] sm:$0xf0]  ;;  %v231_v4 = vrot.slane %v227_v57, 4  ;;  %v240_v20 = vmul.f32 %v238_v58, %v208_v15 }
  0x43   :  { %1002 = vmatpush.bf16.msrb.mxu0 %v1380_v2  ;;  %1028 = vmatpush.bf16.msrb.mxu2 %v1384_v8  ;;  %v2044_v29 = vld [vmem:[#allocation9 + $0x28c] sm:$0xf]  ;;  %v2066_v42 = vld [vmem:[#allocation9 + $0x48] sm:$0xf]  ;;  %v1540_v44 = vor.u32 %v2036_v24, %v2032_v22  ;;  %v1288_v45 = vor.u32 %v2038_v25, %v2042_v28  ;;  %v220_v2 = vrot.slane %v216_v53, 2  ;;  %v223_v8 = vadd.f32 %v219_v0, %v211_v50 }
  0x44   :  { %v2046_v30 = vld [vmem:[#allocation9 + $0x2a8] sm:$0xf0]  ;;  %v2077_v48 = vld [vmem:[#allocation9 + $0x64] sm:$0xf0]  ;;  %v232_v16 = vrot.slane %v228_v59, 4  ;;  %v243_v24 = vrot.slane %v239_v5, 6 }
  0x45   :  { %1015 = vmatpush.bf16.msrb.mxu1 %v1636_v7  ;;  %1041 = vmatpush.bf16.msrb.mxu3 %v1640_v13  ;;  %v2079_v49 = vld [vmem:[#allocation9 + $0x248] sm:$0xf]  ;;  %v2087_v55 = vld [vmem:[#allocation9 + $0x4c] sm:$0xf]  ;;  %v1544_v56 = vor.u32 %v2044_v29, %v2046_v30  ;;  %v1252_v3 = vor.u32 %v2077_v48, %v2066_v42  ;;  %v259_v13 = vmul.f32 %v258_v9, %v203_v34  ;;  %v275_v28 = vrot.slane %v271_v17, 4 }
  0x46   :  { %v2085_v54 = vld [vmem:[#allocation9 + $0x264] sm:$0xf0]  ;;  %v2093_v60 = vld [vmem:[#allocation9 + $0x68] sm:$0xf0]  ;;  %v224_v19 = vadd.f32 %v220_v2, %v212_v1  ;;  %v256_v29 = vmul.f32 %v254_v6, %v202_v47  ;;  %v260_v30 = vmul.f32 %v258_v9, %v2053_v35  ;;  %v250_v35 = vstv %s2099_s13  ;;  %v1451_v59 = vld [vmem:[#allocation9 + $0x1d0] sm:$0xf] }
  0x47   :  { %1003 = vmatpush.bf16.msrb.mxu0 %v1348_v23  ;;  %1029 = vmatpush.bf16.msrb.mxu2 %v1352_v27  ;;  %v2095_v61 = vld [vmem:[#allocation9 + $0x24c] sm:$0xf]  ;;  %v1508_v7 = vor.u32 %v2085_v54, %v2079_v49  ;;  %v1256_v10 = vor.u32 %v2087_v55, %v2093_v60  ;;  %v1219_v21 = vld [vmem:[#allocation9 + $0x8] sm:$0xf]  ;;  %v235_v23 = vadd.f32 %v231_v4, %v223_v8  ;;  %v263_v25 = vrot.slane %v259_v13, 2 }
  0x48   :  { %v2097_v62 = vld [vmem:[#allocation9 + $0x268] sm:$0xf0]  ;;  %v1726_v22 = vld [vmem:[#allocation9 + $0x24] sm:$0xf0]  ;;  %v236_v42 = vadd.f32 %v232_v16, %v224_v19  ;;  %v1847_v4 = vld [vmem:[#allocation9 + $0x3ec] sm:$0xf0] }
  0x49   :  { %1016 = vmatpush.bf16.msrb.mxu1 %v1604_v26  ;;  %1042 = vmatpush.bf16.msrb.mxu3 %v1608_v31  ;;  %v1512_v11 = vor.u32 %v2095_v61, %v2097_v62  ;;  %v283_v26 = vmul.f32 %v282_v18, %v207_v63  ;;  %v1475_v27 = vld [vmem:[#allocation9 + $0x208] sm:$0xf]  ;;  %v272_v31 = vmul.f32 %v270_v14, %v2064_v41  ;;  %v1722_v33 = vld [vmem:[#allocation9 + $0xc] sm:$0xf]  ;;  %v294_v41 = vstv %s2104_s14  ;;  %v1783_v61 = vld [vmem:[#allocation9 + $0x1ec] sm:$0xf0] }
  0x4a   :  { %v267_v34 = vadd.f32 %v263_v25, %v255_v12  ;;  %v1221_v39 = vld [vmem:[#allocation9 + $0x28] sm:$0xf0]  ;;  %v247_v47 = vadd.f32 %v243_v24, %v235_v23  ;;  %v1779_v62 = vld [vmem:[#allocation9 + $0x1d4] sm:$0xf]  ;;  %v1675_v19 = vld [vmem:[#allocation9 + $0x390] sm:$0xf] }
  0x4b   :  { %1004 = vmatpush.bf16.msrb.mxu0 %v1316_v32  ;;  %1030 = vmatpush.bf16.msrb.mxu2 %v1320_v37  ;;  %v1790_v32 = vld [vmem:[#allocation9 + $0x224] sm:$0xf0]  ;;  %v284_v37 = vmul.f32 %v282_v18, %v208_v15  ;;  %v1786_v40 = vld [vmem:[#allocation9 + $0x20c] sm:$0xf]  ;;  %v1224_v52 = vor.u32 %v1722_v33, %v1221_v39  ;;  %v1453_v63 = vld [vmem:[#allocation9 + $0x1f0] sm:$0xf0] }
  0x4c   :  { %v1477_v46 = vld [vmem:[#allocation9 + $0x228] sm:$0xf0]  ;;  %v279_v48 = vadd.f32 %v275_v28, %v267_v34  ;;  %v1476_v51 = vor.u32 %v1790_v32, %v1475_v27  ;;  %v251_v57 = vadd.f32 %v250_v35, %v247_v47  ;;  %v1843_v5 = vld [vmem:[#allocation9 + $0x3d4] sm:$0xf]  ;;  %v1456_v8 = vor.u32 %v1779_v62, %v1453_v63  ;;  %v1767_v27 = vld [vmem:[#allocation9 + $0x16c] sm:$0xf0] }
  0x4d   :  { %1017 = vmatpush.bf16.msrb.mxu1 %v1572_v36  ;;  %1043 = vmatpush.bf16.msrb.mxu3 %v1576_v38  ;;  %v287_v36 = vrot.slane %v283_v26, 6  ;;  %v1220_v38 = vor.u32 %v1726_v22, %v1219_v21  ;;  %v288_v50 = vrot.slane %v284_v37, 6  ;;  %v1480_v54 = vor.u32 %v1786_v40, %v1477_v46  ;;  %v1709_v9 = vld [vmem:[#allocation9 + $0x3f0] sm:$0xf0]  ;;  %v1387_v26 = vld [vmem:[#allocation9 + $0x150] sm:$0xf] }
  0x4e   :  { %v1771_v14 = vld [vmem:[#allocation9 + $0x194] sm:$0xf]  ;;  %v1712_v18 = vor.u32 %v1843_v5, %v1709_v9  ;;  %v1643_v32 = vld [vmem:[#allocation9 + $0x350] sm:$0xf]  ;;  %v1388_v34 = vor.u32 %v1767_v27, %v1387_v26 }
  0x4f   :  { %1005 = vmatpush.bf16.msrb.mxu0 %v1284_v43  ;;  %1031 = vmatpush.bf16.msrb.mxu2 %v1288_v45  ;;  %v244_v43 = vrot.slane %v240_v20, 6  ;;  %v276_v45 = vrot.slane %v272_v31, 4  ;;  %v291_v53 = vadd.f32 %v287_v36, %v279_v48  ;;  %v1421_v15 = vld [vmem:[#allocation9 + $0x1b0] sm:$0xf0]  ;;  %v1839_v20 = vld [vmem:[#allocation9 + $0x3ac] sm:$0xf0] }
  0x50   :  { %v1424_v23 = vor.u32 %v1771_v14, %v1421_v15  ;;  %v1835_v24 = vld [vmem:[#allocation9 + $0x394] sm:$0xf]  ;;  %v1831_v33 = vld [vmem:[#allocation9 + $0x36c] sm:$0xf0] }
  0x51   :  { %1018 = vmatpush.bf16.msrb.mxu1 %v1540_v44  ;;  %1044 = vmatpush.bf16.msrb.mxu3 %v1544_v56  ;;  %v264_v44 = vrot.slane %v260_v30, 2  ;;  %v248_v55 = vadd.f32 %v244_v43, %v236_v42  ;;  %v295_v58 = vadd.f32 %v294_v41, %v291_v53  ;;  %v1677_v25 = vld [vmem:[#allocation9 + $0x3b0] sm:$0xf0]  ;;  %v1676_v30 = vor.u32 %v1839_v20, %v1675_v19  ;;  %v1355_v39 = vld [vmem:[#allocation9 + $0x110] sm:$0xf] }
  0x52   :  { %v1763_v28 = vld [vmem:[#allocation9 + $0x154] sm:$0xf]  ;;  %v1680_v31 = vor.u32 %v1835_v24, %v1677_v25  ;;  %v1759_v40 = vld [vmem:[#allocation9 + $0x12c] sm:$0xf0] }
  0x53   :  { %1006 = vmatpush.bf16.msrb.mxu0 %v1252_v3  ;;  %v268_v49 = vadd.f32 %v264_v44, %v256_v29  ;;  %1032 = vmatpush.bf16.msrb.mxu2 %v1256_v10  ;;  %v299_v0 = vrot.slane %v295_v58, 6  ;;  %v252_v1 = vadd.f32 %v250_v35, %v248_v55  ;;  %v1707_v3 = vld [vmem:[#allocation9 + $0x3d0] sm:$0xf]  ;;  %v1389_v29 = vld [vmem:[#allocation9 + $0x170] sm:$0xf0]  ;;  %v1644_v44 = vor.u32 %v1831_v33, %v1643_v32 }
  0x54   :  { %v1419_v10 = vld [vmem:[#allocation9 + $0x190] sm:$0xf]  ;;  %v1708_v17 = vor.u32 %v1847_v4, %v1707_v3  ;;  %v1392_v36 = vor.u32 %v1763_v28, %v1389_v29  ;;  %v1827_v37 = vld [vmem:[#allocation9 + $0x354] sm:$0xf]  ;;  %v1356_v35 = vor.u32 %v1759_v40, %v1355_v39  ;;  %v1459_v28 = vld [vmem:[#allocation9 + $0x1d8] sm:$0xf] }
  0x55   :  { %1019 = vmatpush.bf16.msrb.mxu1 %v1508_v7  ;;  %1045 = vmatpush.bf16.msrb.mxu3 %v1512_v11  ;;  %v280_v56 = vadd.f32 %v276_v45, %v268_v49  ;;  %v304_v6 = vsel %vm303_vm0, %v251_v57, %v299_v0  ;;  %v1452_v7 = vor.u32 %v1783_v61, %v1451_v59  ;;  %v1775_v11 = vld [vmem:[#allocation9 + $0x1ac] sm:$0xf0]  ;;  %v1755_v42 = vld [vmem:[#allocation9 + $0x114] sm:$0xf]  ;;  %v1784_v29 = vld [vmem:[#allocation9 + $0x1f4] sm:$0xf0] }
  0x56   :  { %v2120_v12 = vpack.c.bf16 %v304_v6, %v304_v6  ;;  %v1420_v22 = vor.u32 %v1775_v11, %v1419_v10  ;;  %v1357_v43 = vld [vmem:[#allocation9 + $0x130] sm:$0xf0]  ;;  %v1611_v46 = vld [vmem:[#allocation9 + $0x310] sm:$0xf] }
  0x57   :  { %1007 = vmatpush.bf16.msrb.mxu0 %v1220_v38  ;;  %v292_v60 = vadd.f32 %v288_v50, %v280_v56  ;;  %1033 = vmatpush.bf16.msrb.mxu2 %v1224_v52  ;;  %v1645_v38 = vld [vmem:[#allocation9 + $0x370] sm:$0xf0]  ;;  %v1823_v47 = vld [vmem:[#allocation9 + $0x32c] sm:$0xf0]  ;;  %v1360_v48 = vor.u32 %v1755_v42, %v1357_v43  ;;  %v1715_v42 = vld [vmem:[#allocation9 + $0x3d8] sm:$0xf] }
  0x58   :  { %982 = vmatmul.bf16.vlgmr.msra.gmra.mxu2 %v2120_v12  ;;  %956 = vmatmul.bf16.vlgmr.msra.gmra.mxu0 %v2120_v12  ;;  %v1648_v45 = vor.u32 %v1827_v37, %v1645_v38  ;;  %v1613_v49 = vld [vmem:[#allocation9 + $0x330] sm:$0xf0]  ;;  %v1323_v50 = vld [vmem:[#allocation9 + $0xd0] sm:$0xf]  ;;  %v1848_v43 = vld [vmem:[#allocation9 + $0x3f4] sm:$0xf0] }
  0x59   :  { %1020 = vmatpush.bf16.msrb.mxu1 %v1476_v51  ;;  %1046 = vmatpush.bf16.msrb.mxu3 %v1480_v54  ;;  %v296_v2 = vadd.f32 %v294_v41, %v292_v60  ;;  %v1819_v41 = vld [vmem:[#allocation9 + $0x314] sm:$0xf]  ;;  %v1751_v51 = vld [vmem:[#allocation9 + $0xec] sm:$0xf0]  ;;  %v1612_v54 = vor.u32 %v1823_v47, %v1611_v46  ;;  %v1844_v46 = vld [vmem:[#allocation9 + $0x3dc] sm:$0xf] }
  0x5a   :  { %v1747_v52 = vld [vmem:[#allocation9 + $0xd4] sm:$0xf]  ;;  %v1616_v55 = vor.u32 %v1819_v41, %v1613_v49  ;;  %v1579_v56 = vld [vmem:[#allocation9 + $0x2d0] sm:$0xf]  ;;  %v1324_v58 = vor.u32 %v1751_v51, %v1323_v50  ;;  %v1717_v47 = vld [vmem:[#allocation9 + $0x3f8] sm:$0xf0] }
  0x5b   :  { %v300_v13 = vrot.slane %v296_v2, 6  ;;  %1052 = vmatpush.bf16.msra.mxu0 %v1452_v7  ;;  %1078 = vmatpush.bf16.msra.mxu2 %v1456_v8  ;;  %v1325_v53 = vld [vmem:[#allocation9 + $0xf0] sm:$0xf0]  ;;  %v1815_v57 = vld [vmem:[#allocation9 + $0x2ec] sm:$0xf0] }
  0x5c   :  { %v1328_v59 = vor.u32 %v1747_v52, %v1325_v53  ;;  %v1811_v60 = vld [vmem:[#allocation9 + $0x2d4] sm:$0xf]  ;;  %v1291_v62 = vld [vmem:[#allocation9 + $0x90] sm:$0xf]  ;;  %v1580_v2 = vor.u32 %v1815_v57, %v1579_v56  ;;  %v1772_v41 = vld [vmem:[#allocation9 + $0x19c] sm:$0xf]  ;;  %v1716_v52 = vor.u32 %v1848_v43, %v1715_v42  ;;  %v1720_v53 = vor.u32 %v1844_v46, %v1717_v47 }
  0x5d   :  { %v305_v16 = vsel %vm303_vm0, %v252_v1, %v300_v13  ;;  %v1581_v61 = vld [vmem:[#allocation9 + $0x2f0] sm:$0xf0]  ;;  %v1743_v63 = vld [vmem:[#allocation9 + $0xac] sm:$0xf0]  ;;  %v1429_v49 = vld [vmem:[#allocation9 + $0x1b8] sm:$0xf0] }
  0x5e   :  { %v2125_v21 = vpack.c.bf16 %v305_v16, %v305_v16  ;;  %v1739_v0 = vld [vmem:[#allocation9 + $0x94] sm:$0xf]  ;;  %v1584_v3 = vor.u32 %v1811_v60, %v1581_v61  ;;  %v1547_v4 = vld [vmem:[#allocation9 + $0x290] sm:$0xf]  ;;  %v1292_v6 = vor.u32 %v1743_v63, %v1291_v62  ;;  %v1432_v57 = vor.u32 %v1772_v41, %v1429_v49  ;;  %v1395_v60 = vld [vmem:[#allocation9 + $0x158] sm:$0xf] }
  0x5f   :  { %1053 = vmatpush.bf16.msra.mxu0 %v1420_v22  ;;  %1079 = vmatpush.bf16.msra.mxu2 %v1424_v23  ;;  %v1293_v1 = vld [vmem:[#allocation9 + $0xb0] sm:$0xf0]  ;;  %v1807_v5 = vld [vmem:[#allocation9 + $0x2ac] sm:$0xf0]  ;;  %v1768_v61 = vld [vmem:[#allocation9 + $0x174] sm:$0xf0] }
  0x60   :  { %995 = vmatmul.bf16.vlgmr.msra.gmra.mxu3 %v2125_v21  ;;  %969 = vmatmul.bf16.vlgmr.msra.gmra.mxu1 %v2125_v21  ;;  %v1296_v7 = vor.u32 %v1739_v0, %v1293_v1  ;;  %v1803_v8 = vld [vmem:[#allocation9 + $0x294] sm:$0xf]  ;;  %v1259_v10 = vld [vmem:[#allocation9 + $0x50] sm:$0xf]  ;;  %v1548_v15 = vor.u32 %v1807_v5, %v1547_v4  ;;  %v1764_v62 = vld [vmem:[#allocation9 + $0x15c] sm:$0xf]  ;;  %v1396_v4 = vor.u32 %v1768_v61, %v1395_v60 }
  0x61   :  { %1065 = vmatpush.bf16.msra.mxu1 %v1708_v17  ;;  %1091 = vmatpush.bf16.msra.mxu3 %v1712_v18  ;;  %v1549_v9 = vld [vmem:[#allocation9 + $0x2b0] sm:$0xf0]  ;;  %v1735_v11 = vld [vmem:[#allocation9 + $0x6c] sm:$0xf0]  ;;  %v1397_v63 = vld [vmem:[#allocation9 + $0x178] sm:$0xf0] }
  0x62   :  { %v1731_v13 = vld [vmem:[#allocation9 + $0x54] sm:$0xf]  ;;  %v1552_v16 = vor.u32 %v1803_v8, %v1549_v9  ;;  %v1515_v17 = vld [vmem:[#allocation9 + $0x250] sm:$0xf]  ;;  %v1260_v20 = vor.u32 %v1735_v11, %v1259_v10  ;;  %v1400_v5 = vor.u32 %v1764_v62, %v1397_v63  ;;  %v1363_v8 = vld [vmem:[#allocation9 + $0x118] sm:$0xf] }
  0x63   :  { %1054 = vmatpush.bf16.msra.mxu0 %v1388_v34  ;;  %1080 = vmatpush.bf16.msra.mxu2 %v1392_v36  ;;  %v1261_v14 = vld [vmem:[#allocation9 + $0x70] sm:$0xf0]  ;;  %v1799_v18 = vld [vmem:[#allocation9 + $0x26c] sm:$0xf0]  ;;  %v1760_v9 = vld [vmem:[#allocation9 + $0x134] sm:$0xf0] }
  0x64   :  { %v1795_v19 = vld [vmem:[#allocation9 + $0x254] sm:$0xf]  ;;  %v1264_v22 = vor.u32 %v1731_v13, %v1261_v14  ;;  %v1227_v24 = vld [vmem:[#allocation9 + $0x10] sm:$0xf]  ;;  %v1516_v32 = vor.u32 %v1799_v18, %v1515_v17  ;;  %v1756_v10 = vld [vmem:[#allocation9 + $0x11c] sm:$0xf]  ;;  %v1364_v17 = vor.u32 %v1760_v9, %v1363_v8 }
  0x65   :  { %1066 = vmatpush.bf16.msra.mxu1 %v1676_v30  ;;  %1092 = vmatpush.bf16.msra.mxu3 %v1680_v31  ;;  %v1517_v23 = vld [vmem:[#allocation9 + $0x270] sm:$0xf0]  ;;  %v1727_v25 = vld [vmem:[#allocation9 + $0x2c] sm:$0xf0]  ;;  %v1780_v30 = vld [vmem:[#allocation9 + $0x1dc] sm:$0xf] }
  0x66   :  { %v1723_v26 = vld [vmem:[#allocation9 + $0x14] sm:$0xf]  ;;  %v1461_v31 = vld [vmem:[#allocation9 + $0x1f8] sm:$0xf0]  ;;  %v1520_v33 = vor.u32 %v1795_v19, %v1517_v23  ;;  %v1483_v34 = vld [vmem:[#allocation9 + $0x210] sm:$0xf]  ;;  %v1228_v38 = vor.u32 %v1727_v25, %v1227_v24 }
  0x67   :  { %1055 = vmatpush.bf16.msra.mxu0 %v1356_v35  ;;  %1081 = vmatpush.bf16.msra.mxu2 %v1360_v48  ;;  %v1229_v27 = vld [vmem:[#allocation9 + $0x30] sm:$0xf0]  ;;  %v1791_v36 = vld [vmem:[#allocation9 + $0x22c] sm:$0xf0]  ;;  %v1427_v35 = vld [vmem:[#allocation9 + $0x198] sm:$0xf] }
  0x68   :  { %1034 = vmatmul.bf16.vlgmr.msrb.gmra.mxu2 %v2120_v12  ;;  %1008 = vmatmul.bf16.vlgmr.msrb.gmra.mxu0 %v2120_v12  ;;  %v1787_v37 = vld [vmem:[#allocation9 + $0x214] sm:$0xf]  ;;  %v1232_v39 = vor.u32 %v1723_v26, %v1229_v27  ;;  %v1776_v48 = vld [vmem:[#allocation9 + $0x1b4] sm:$0xf0]  ;;  %v1484_v50 = vor.u32 %v1791_v36, %v1483_v34  ;;  %v1365_v11 = vld [vmem:[#allocation9 + $0x138] sm:$0xf0] }
  0x69   :  { %1067 = vmatpush.bf16.msra.mxu1 %v1644_v44  ;;  %1093 = vmatpush.bf16.msra.mxu3 %v1648_v45  ;;  %v1485_v40 = vld [vmem:[#allocation9 + $0x230] sm:$0xf0]  ;;  %v1460_v44 = vor.u32 %v1784_v29, %v1459_v28  ;;  %v1464_v45 = vor.u32 %v1780_v30, %v1461_v31  ;;  %v1428_v56 = vor.u32 %v1776_v48, %v1427_v35  ;;  %v1820_v19 = vld [vmem:[#allocation9 + $0x31c] sm:$0xf]  ;;  %v1752_v23 = vld [vmem:[#allocation9 + $0xf4] sm:$0xf0] }
  0x6a   :  { %v1488_v51 = vor.u32 %v1787_v37, %v1485_v40  ;;  %v1368_v18 = vor.u32 %v1756_v10, %v1365_v11  ;;  %v1748_v24 = vld [vmem:[#allocation9 + $0xdc] sm:$0xf]  ;;  %v1587_v28 = vld [vmem:[#allocation9 + $0x2d8] sm:$0xf] }
  0x6b   :  { %1056 = vmatpush.bf16.msra.mxu0 %v1324_v58  ;;  %1082 = vmatpush.bf16.msra.mxu2 %v1328_v59  ;;  %v1836_v58 = vld [vmem:[#allocation9 + $0x39c] sm:$0xf]  ;;  %v1816_v29 = vld [vmem:[#allocation9 + $0x2f4] sm:$0xf0] }
  0x6c   :  { %v1685_v59 = vld [vmem:[#allocation9 + $0x3b8] sm:$0xf0]  ;;  %v1299_v34 = vld [vmem:[#allocation9 + $0x98] sm:$0xf] }
  0x6d   :  { %1068 = vmatpush.bf16.msra.mxu1 %v1612_v54  ;;  %1094 = vmatpush.bf16.msra.mxu3 %v1616_v55  ;;  %v1683_v54 = vld [vmem:[#allocation9 + $0x398] sm:$0xf]  ;;  %v1688_v1 = vor.u32 %v1836_v58, %v1685_v59  ;;  %v1333_v25 = vld [vmem:[#allocation9 + $0xf8] sm:$0xf0] }
  0x6e   :  { %v1840_v55 = vld [vmem:[#allocation9 + $0x3b4] sm:$0xf0]  ;;  %v1336_v31 = vor.u32 %v1748_v24, %v1333_v25  ;;  %v1740_v37 = vld [vmem:[#allocation9 + $0x9c] sm:$0xf] }
  0x6f   :  { %1057 = vmatpush.bf16.msra.mxu0 %v1292_v6  ;;  %1083 = vmatpush.bf16.msra.mxu2 %v1296_v7  ;;  %v1684_v0 = vor.u32 %v1840_v55, %v1683_v54  ;;  %v1828_v6 = vld [vmem:[#allocation9 + $0x35c] sm:$0xf]  ;;  %v1744_v36 = vld [vmem:[#allocation9 + $0xb4] sm:$0xf0] }
  0x70   :  { %1047 = vmatmul.bf16.vlgmr.msrb.gmra.mxu3 %v2125_v21  ;;  %1021 = vmatmul.bf16.vlgmr.msrb.gmra.mxu1 %v2125_v21  ;;  %v1653_v7 = vld [vmem:[#allocation9 + $0x378] sm:$0xf0]  ;;  %v1555_v42 = vld [vmem:[#allocation9 + $0x298] sm:$0xf] }
  0x71   :  { %1069 = vmatpush.bf16.msra.mxu1 %v1580_v2  ;;  %1095 = vmatpush.bf16.msra.mxu3 %v1584_v3  ;;  %v1651_v2 = vld [vmem:[#allocation9 + $0x358] sm:$0xf]  ;;  %v1656_v14 = vor.u32 %v1828_v6, %v1653_v7  ;;  %v1804_v46 = vld [vmem:[#allocation9 + $0x29c] sm:$0xf] }
  0x72   :  { %v1832_v3 = vld [vmem:[#allocation9 + $0x374] sm:$0xf0]  ;;  %v1557_v47 = vld [vmem:[#allocation9 + $0x2b8] sm:$0xf0] }
  0x73   :  { %1058 = vmatpush.bf16.msra.mxu0 %v1260_v20  ;;  %1084 = vmatpush.bf16.msra.mxu2 %v1264_v22  ;;  %v1652_v13 = vor.u32 %v1832_v3, %v1651_v2  ;;  %v1621_v20 = vld [vmem:[#allocation9 + $0x338] sm:$0xf0]  ;;  %v1331_v22 = vld [vmem:[#allocation9 + $0xd8] sm:$0xf] }
  0x74   :  { %v1624_v27 = vor.u32 %v1820_v19, %v1621_v20  ;;  %v1332_v30 = vor.u32 %v1752_v23, %v1331_v22  ;;  %v1808_v43 = vld [vmem:[#allocation9 + $0x2b4] sm:$0xf0]  ;;  %v1732_v41 = vld [vmem:[#allocation9 + $0x5c] sm:$0xf] }
  0x75   :  { %1070 = vmatpush.bf16.msra.mxu1 %v1548_v15  ;;  %1096 = vmatpush.bf16.msra.mxu3 %v1552_v16  ;;  %v1619_v15 = vld [vmem:[#allocation9 + $0x318] sm:$0xf]  ;;  %v1269_v49 = vld [vmem:[#allocation9 + $0x78] sm:$0xf0] }
  0x76   :  { %v1824_v16 = vld [vmem:[#allocation9 + $0x334] sm:$0xf0]  ;;  %v1272_v55 = vor.u32 %v1732_v41, %v1269_v49  ;;  %v1724_v60 = vld [vmem:[#allocation9 + $0x1c] sm:$0xf] }
  0x77   :  { %1059 = vmatpush.bf16.msra.mxu0 %v1228_v38  ;;  %1085 = vmatpush.bf16.msra.mxu2 %v1232_v39  ;;  %v1620_v26 = vor.u32 %v1824_v16, %v1619_v15  ;;  %v1301_v38 = vld [vmem:[#allocation9 + $0xb8] sm:$0xf0]  ;;  %v1588_v39 = vor.u32 %v1816_v29, %v1587_v28  ;;  %v1267_v35 = vld [vmem:[#allocation9 + $0x58] sm:$0xf] }
  0x78   :  { %v1736_v48 = vld [vmem:[#allocation9 + $0x74] sm:$0xf0]  ;;  %v1237_v61 = vld [vmem:[#allocation9 + $0x38] sm:$0xf0] }
  0x79   :  { %1071 = vmatpush.bf16.msra.mxu1 %v1516_v32  ;;  %1097 = vmatpush.bf16.msra.mxu3 %v1520_v33  ;;  %v1812_v32 = vld [vmem:[#allocation9 + $0x2dc] sm:$0xf]  ;;  %v1268_v54 = vor.u32 %v1736_v48, %v1267_v35  ;;  %v1235_v58 = vld [vmem:[#allocation9 + $0x18] sm:$0xf]  ;;  %v1240_v3 = vor.u32 %v1724_v60, %v1237_v61 }
  0x7a   :  { %1086 = vmatmul.bf16.vlgmr.msra.gmra.mxu2 %v2120_v12  ;;  %1060 = vmatmul.bf16.vlgmr.msra.gmra.mxu0 %v2120_v12  ;;  %v1589_v33 = vld [vmem:[#allocation9 + $0x2f8] sm:$0xf0]  ;;  %v1728_v59 = vld [vmem:[#allocation9 + $0x34] sm:$0xf0] }
  0x7b   :  { %1104 = vmatpush.bf16.msrb.mxu0 %v1460_v44  ;;  %1130 = vmatpush.bf16.msrb.mxu2 %v1464_v45  ;;  %v1592_v40 = vor.u32 %v1812_v32, %v1589_v33  ;;  %v1300_v44 = vor.u32 %v1744_v36, %v1299_v34  ;;  %v1304_v45 = vor.u32 %v1740_v37, %v1301_v38  ;;  %v1792_v2 = vld [vmem:[#allocation9 + $0x234] sm:$0xf0] }
  0x7d   :  { %1072 = vmatpush.bf16.msra.mxu1 %v1484_v50  ;;  %1098 = vmatpush.bf16.msra.mxu3 %v1488_v51  ;;  %v1556_v50 = vor.u32 %v1808_v43, %v1555_v42  ;;  %v1560_v51 = vor.u32 %v1804_v46, %v1557_v47 }
  0x7f   :  { %1105 = vmatpush.bf16.msrb.mxu0 %v1428_v56  ;;  %1131 = vmatpush.bf16.msrb.mxu2 %v1432_v57  ;;  %v1796_v56 = vld [vmem:[#allocation9 + $0x25c] sm:$0xf] }
  0x80   :  { %1099 = vmatmul.bf16.vlgmr.msra.gmra.mxu3 %v2125_v21  ;;  %1073 = vmatmul.bf16.vlgmr.msra.gmra.mxu1 %v2125_v21  ;;  %v1525_v57 = vld [vmem:[#allocation9 + $0x278] sm:$0xf0] }
  0x81   :  { %1117 = vmatpush.bf16.msrb.mxu1 %v1716_v52  ;;  %1143 = vmatpush.bf16.msrb.mxu3 %v1720_v53  ;;  %v1523_v52 = vld [vmem:[#allocation9 + $0x258] sm:$0xf]  ;;  %v1528_v63 = vor.u32 %v1796_v56, %v1525_v57 }
  0x82   :  { %v1800_v53 = vld [vmem:[#allocation9 + $0x274] sm:$0xf0] }
  0x83   :  { %1106 = vmatpush.bf16.msrb.mxu0 %v1396_v4  ;;  %1132 = vmatpush.bf16.msrb.mxu2 %v1400_v5  ;;  %v1524_v62 = vor.u32 %v1800_v53, %v1523_v52  ;;  %v1788_v4 = vld [vmem:[#allocation9 + $0x21c] sm:$0xf] }
  0x84   :  { %v1493_v5 = vld [vmem:[#allocation9 + $0x238] sm:$0xf0] }
  0x85   :  { %1118 = vmatpush.bf16.msrb.mxu1 %v1684_v0  ;;  %1144 = vmatpush.bf16.msrb.mxu3 %v1688_v1  ;;  %v1491_v0 = vld [vmem:[#allocation9 + $0x218] sm:$0xf]  ;;  %v1236_v1 = vor.u32 %v1728_v59, %v1235_v58  ;;  %v1496_v7 = vor.u32 %v1788_v4, %v1493_v5 }
  0x86   :  { %v1492_v6 = vor.u32 %v1792_v2, %v1491_v0 }
  0x87   :  { %1107 = vmatpush.bf16.msrb.mxu0 %v1364_v17  ;;  %1133 = vmatpush.bf16.msrb.mxu2 %v1368_v18 }
  0x89   :  { %1119 = vmatpush.bf16.msrb.mxu1 %v1652_v13  ;;  %1145 = vmatpush.bf16.msrb.mxu3 %v1656_v14 }
  0x8b   :  { %1108 = vmatpush.bf16.msrb.mxu0 %v1332_v30  ;;  %1134 = vmatpush.bf16.msrb.mxu2 %v1336_v31 }
  0x8d   :  { %1120 = vmatpush.bf16.msrb.mxu1 %v1620_v26  ;;  %1146 = vmatpush.bf16.msrb.mxu3 %v1624_v27 }
  0x8f   :  { %1109 = vmatpush.bf16.msrb.mxu0 %v1300_v44  ;;  %1135 = vmatpush.bf16.msrb.mxu2 %v1304_v45 }
  0x91   :  { %1121 = vmatpush.bf16.msrb.mxu1 %v1588_v39  ;;  %1147 = vmatpush.bf16.msrb.mxu3 %v1592_v40 }
  0x93   :  { %1110 = vmatpush.bf16.msrb.mxu0 %v1268_v54  ;;  %1136 = vmatpush.bf16.msrb.mxu2 %v1272_v55 }
  0x95   :  { %1122 = vmatpush.bf16.msrb.mxu1 %v1556_v50  ;;  %1148 = vmatpush.bf16.msrb.mxu3 %v1560_v51 }
  0x97   :  { %1111 = vmatpush.bf16.msrb.mxu0 %v1236_v1  ;;  %1137 = vmatpush.bf16.msrb.mxu2 %v1240_v3 }
  0x99   :  { %1123 = vmatpush.bf16.msrb.mxu1 %v1524_v62  ;;  %1149 = vmatpush.bf16.msrb.mxu3 %v1528_v63 }
  0x9a   :  { %1112 = vmatmul.bf16.vlgmr.msrb.gmra.mxu0 %v2120_v12  ;;  %1138 = vmatmul.bf16.vlgmr.msrb.gmra.mxu2 %v2120_v12 }
  0x9d   :  { %1124 = vmatpush.bf16.msrb.mxu1 %v1492_v6  ;;  %1150 = vmatpush.bf16.msrb.mxu3 %v1496_v7 }
  0xa0   :  { %1125 = vmatmul.bf16.vlgmr.msrb.gmra.mxu1 %v2125_v21  ;;  %1151 = vmatmul.bf16.vlgmr.msrb.gmra.mxu3 %v2125_v21 }
  0xd5   :  { %v957_v8 = vpop.f32.mrf.mxu0 }
  0xdb   :  { %v983_v10 = vpop.f32.mrf.mxu2 }
  0xdd   :  { %v970_v9 = vpop.f32.mrf.mxu1  ;;  %v959_v11 = vpop.f32.mrf.mxu0 }
  0xde   :  { %v971_v14 = vadd.f32 %v970_v9, %v957_v8 }
  0xe3   :  { %v996_v13 = vpop.f32.mrf.mxu3  ;;  %v985_v19 = vpop.f32.mrf.mxu2 }
  0xe4   :  { %v997_v15 = vadd.f32 %v996_v13, %v983_v10 }
  0xe5   :  { %v972_v16 = vpop.f32.mrf.mxu1  ;;  %v1009_v12 = vpop.f32.mrf.mxu0 }
  0xe6   :  { %v1164_v17 = vrot.slane %v997_v15, 4 }
  0xe8   :  { %v1169_v18 = vsel %vm1168_vm1, %v971_v14, %v1164_v17 }
  0xe9   :  { %1177 = vst [vmem:[#allocation11] sm:$0xff] %v1169_v18 }
  0xeb   :  { %v998_v20 = vpop.f32.mrf.mxu3  ;;  %v1035_v23 = vpop.f32.mrf.mxu2 }
  0xed   :  { %v1022_v22 = vpop.f32.mrf.mxu1  ;;  %v1011_v26 = vpop.f32.mrf.mxu0 }
  0xee   :  { %v1023_v21 = vadd.f32 %v1022_v22, %v1009_v12 }
  0xf3   :  { %v1048_v24 = vpop.f32.mrf.mxu3  ;;  %v1037_v30 = vpop.f32.mrf.mxu2 }
  0xf4   :  { %v1049_v25 = vadd.f32 %v1048_v24, %v1035_v23 }
  0xf5   :  { %v1024_v27 = vpop.f32.mrf.mxu1 }
  0xf6   :  { %v1165_v28 = vrot.slane %v1049_v25, 4 }
  0xf7   :  { %v1061_v32 = vpop.f32.mrf.mxu0 }
  0xf8   :  { %v1170_v29 = vsel %vm1168_vm1, %v1023_v21, %v1165_v28 }
  0xf9   :  { %1178 = vst [vmem:[#allocation11 + $0x8] sm:$0xff] %v1170_v29 }
  0xfb   :  { %v1050_v31 = vpop.f32.mrf.mxu3 }
  0xfd   :  { %v1074_v33 = vpop.f32.mrf.mxu1  ;;  %v1087_v34 = vpop.f32.mrf.mxu2 }
  0xfe   :  { %v1075_v37 = vadd.f32 %v1074_v33, %v1061_v32 }
  0xff   :  { %v1063_v40 = vpop.f32.mrf.mxu0 }
 0x103   :  { %v1100_v36 = vpop.f32.mrf.mxu3 }
 0x104   :  { %v1101_v38 = vadd.f32 %v1100_v36, %v1087_v34 }
 0x105   :  { %v1076_v42 = vpop.f32.mrf.mxu1  ;;  %v1089_v44 = vpop.f32.mrf.mxu2 }
 0x106   :  { %v1166_v39 = vrot.slane %v1101_v38, 4 }
 0x108   :  { %v1171_v43 = vsel %vm1168_vm1, %v1075_v37, %v1166_v39 }
 0x109   :  { %1179 = vst [vmem:[#allocation11 + $0x10] sm:$0xff] %v1171_v43 }
 0x10b   :  { %v1102_v45 = vpop.f32.mrf.mxu3 }
 0x117   :  { %v1113_v46 = vpop.f32.mrf.mxu0 }
 0x11d   :  { %v1126_v47 = vpop.f32.mrf.mxu1  ;;  %v1139_v35 = vpop.f32.mrf.mxu2 }
 0x11e   :  { %v1127_v51 = vadd.f32 %v1126_v47, %v1113_v46 }
 0x11f   :  { %v1115_v41 = vpop.f32.mrf.mxu0 }
 0x123   :  { %v1152_v48 = vpop.f32.mrf.mxu3 }
 0x124   :  { %v1153_v49 = vadd.f32 %v1152_v48, %v1139_v35 }
 0x125   :  { %v1128_v50 = vpop.f32.mrf.mxu1  ;;  %v1141_v54 = vpop.f32.mrf.mxu2 }
 0x126   :  { %v1167_v52 = vrot.slane %v1153_v49, 4 }
 0x128   :  { %v1172_v53 = vsel %vm1168_vm1, %v1127_v51, %v1167_v52 }
 0x129   :  { %1180 = vst [vmem:[#allocation11 + $0x18] sm:$0xff] %v1172_v53 }
 0x12a   :  { %1191 = dma.vmem_to_hbm [thread:$0]  %s1187_s16, 512, %s1189_s19, [#allocation4]  }
 0x12b   :  { %v1154_v55 = vpop.f32.mrf.mxu3 }
 0x12c   :  { %1960 = dma.done.wait [#allocation4], 512  }
 0x12d   :  { %1961 = vsyncadd [#allocation4], 4294966784 }
 0x12e   :  { %1196 = vsyncpa [#allocation3], 1 }
 0x12f   :  { %1197 = vsyncpa [#allocation10], 1 }
 0x130   :  { %1198 = vsyncpa [#allocation4], 1 }
 0x131   :  { %1199 = vsyncpa [#allocation5], 1 }
 0x132   :  { %1200 = vsyncpa [#allocation7], 1 }

</bundles_post_ra>
